<compile_context>
chip_gen: v5e
topology: v5e:2x2
jax: 0.10.0
libtpu: 0.0.40
codegen_flags: <defaults>
</compile_context>

<pallas_src>
import functools

import numpy as np
import jax
import jax.numpy as jnp
from jax.experimental import pallas as pl
from jax.experimental.pallas import tpu as pltpu


def _round_up(x, m):
    return ((x + m - 1) // m) * m


def _actor_kernel(rep_ref, aware_ref, task_ref, nbr_ref, rmask_ref,
                  w1r_ref, w1a_ref, w1t_ref, w1n_ref, w1m_ref, b1_ref,
                  w2_ref, b2_ref, wh_ref, bh_ref,
                  seg_ref, place_ref, base_ref,
                  out_ref, *, device_num):
    f32 = jnp.float32

    def bdot(a, w_ref):
        # bf16 MXU operands, f32 accumulation.
        return jnp.dot(a.astype(jnp.bfloat16), w_ref[...], preferred_element_type=f32)

    # ---- trunk: fc1 -> relu -> fc2 -> relu (dropout = identity in eval) -----
    # fc1(concat(inputs)) == sum of per-input-segment matmuls: no host-side
    # concatenate / zero-pad needed.
    h1 = (bdot(rep_ref[...], w1r_ref) + bdot(aware_ref[...], w1a_ref)
          + bdot(task_ref[...], w1t_ref) + bdot(nbr_ref[...], w1n_ref)
          + bdot(rmask_ref[...], w1m_ref) + b1_ref[...])
    h1 = jnp.maximum(h1, 0.0)                                        # (TB, H)
    h2 = jnp.maximum(bdot(h1, w2_ref) + b2_ref[...], 0.0)            # (TB, H)

    # ---- fused offload + server heads (lane-padded to 128) -------------------
    logits = bdot(h2, wh_ref) + bh_ref[...]                          # (TB, HEAD_PAD)

    # ---- in-kernel reputation-mask gather (vectorized) -----------------------
    # gathered[b, d*N + n] = reputation_mask[b, int(neighbor_matrix[b, d, n])]
    rmask = rmask_ref[...]                                           # (TB, D)
    nbr_idx = jnp.floor(nbr_ref[...])                                # (TB, D*N)
    gathered = jnp.zeros_like(nbr_idx)
    for k in range(device_num):                                      # static, small
        gathered = gathered + jnp.where(nbr_idx == k, rmask[:, k:k + 1], 0.0)
    # Place neighbor-mask values onto their head lanes; base == 1 on the
    # 'self' / 'last' offload lanes and all server lanes, 0 on neighbor lanes
    # (filled by the gather) and on padding lanes.
    mask_flat = jnp.dot(gathered, place_ref[...],
                        preferred_element_type=f32) + base_ref[...]  # (TB, HEAD_PAD)

    # ---- collapsed masked softmax:  out = e*mask / sum_seg(e*mask) -----------
    # Identical to softmax -> *mask -> renormalize (softmax denominator cancels);
    # server lanes have mask == 1 so this is their plain softmax.
    m = jnp.max(logits, axis=-1, keepdims=True)                      # (TB, 1)
    me = jnp.exp(logits - m) * mask_flat                             # (TB, HEAD_PAD)
    denom = jnp.dot(me.astype(jnp.bfloat16), seg_ref[...],
                    preferred_element_type=f32)                      # per-segment sums
    out_ref[...] = me * pl.reciprocal(jnp.maximum(denom, 1e-30), approx=True)


def init_params(key, device_num, neighbors_num, hidden_dim=256):
    D, N, H = device_num, neighbors_num, hidden_dim
    K = N + 2
    seg_dims = (D * D, 32, D, D * N, D)          # rep, aware, task, nbr, rmask
    IN = sum(seg_dims)
    HEAD = D * K + 2 * D
    HEAD_PAD = _round_up(HEAD, 128)

    def xavier(k, out_f, in_f):
        a = (6.0 / (in_f + out_f)) ** 0.5
        return jax.random.uniform(k, (out_f, in_f), jnp.float32, -a, a)

    k1, k2, k3, k4 = jax.random.split(key, 4)
    W1 = xavier(k1, H, IN)                       # PyTorch layout (out, in)
    W2 = xavier(k2, H, H)
    W_off = xavier(k3, D * K, H)                 # offload_head.weight
    W_srv = xavier(k4, 2 * D, H)                 # server_head.weight

    # fc1 weight split into per-input-segment slabs, each (L_seg, H), bf16.
    W1T = W1.T                                   # (IN, H)
    offs = [0]
    for L in seg_dims:
        offs.append(offs[-1] + L)
    slabs = [W1T[offs[i]:offs[i + 1], :].astype(jnp.bfloat16) for i in range(5)]

    # Fused head: cols [0, D*K) offload head, [D*K, HEAD) server head, rest 0-pad.
    w_head = jnp.zeros((H, HEAD_PAD), jnp.float32)
    w_head = w_head.at[:, :D * K].set(W_off.T).at[:, D * K:HEAD].set(W_srv.T)
    w_head = w_head.astype(jnp.bfloat16)

    # Segment indicator: seg[i, j] == 1 iff head lanes i, j share a softmax row.
    ids = np.full(HEAD_PAD, -1, np.int64)
    ids[:D * K] = np.repeat(np.arange(D), K)
    ids[D * K:HEAD] = D + np.repeat(np.arange(D), 2)
    seg = ((ids[:, None] == ids[None, :]) & (ids[:, None] >= 0)).astype(np.float32)

    # Neighbor placement: gathered lane d*N + n  ->  head lane d*K + 1 + n.
    place = np.zeros((D * N, HEAD_PAD), np.float32)
    for d in range(D):
        for n in range(N):
            place[d * N + n, d * K + 1 + n] = 1.0

    # Base mask: 1 on 'self' (j=0) / 'last' (j=K-1) offload lanes and all server
    # lanes, 0 on neighbor lanes and padding lanes.
    base = np.zeros((1, HEAD_PAD), np.float32)
    for d in range(D):
        base[0, d * K] = 1.0
        base[0, d * K + K - 1] = 1.0
    base[0, D * K:HEAD] = 1.0

    return {
        "w1_rep": slabs[0], "w1_aware": slabs[1], "w1_task": slabs[2],
        "w1_nbr": slabs[3], "w1_mask": slabs[4],
        "b1": jnp.zeros((1, H), jnp.float32),
        "w2": W2.T.astype(jnp.bfloat16),
        "b2": jnp.zeros((1, H), jnp.float32),
        "w_head": w_head,
        "b_head": jnp.zeros((1, HEAD_PAD), jnp.float32),
        "seg": jnp.asarray(seg, jnp.bfloat16),
        "place": jnp.asarray(place, jnp.float32),
        "base": jnp.asarray(base, jnp.float32),
    }


@functools.partial(jax.jit, static_argnames=("batch_tile",))
def multi_actor_forward_batched(params, reputation_matrix, reputation_aware,
                                task_vector, neighbor_matrix, reputation_mask,
                                *, batch_tile=256):
    """Batched forward: every input carries a leading batch dim B."""
    B, D = reputation_mask.shape
    N = neighbor_matrix.shape[-1]
    K = N + 2
    HEAD = D * K + 2 * D
    HEAD_PAD = params["w_head"].shape[1]

    f32 = jnp.float32
    rows = [
        reputation_matrix.reshape(B, -1).astype(f32),    # (B, D*D)
        reputation_aware.reshape(B, -1).astype(f32),      # (B, 32)
        task_vector.reshape(B, -1).astype(f32),           # (B, D)
        neighbor_matrix.reshape(B, -1).astype(f32),       # (B, D*N)
        reputation_mask.reshape(B, -1).astype(f32),       # (B, D)
    ]

    # Batch tiling: >= 8 rows (sublane granule); 256-row tiles fill the
    # v6e/v7x MXU (use batch_tile=128 on v5e).
    TB = min(batch_tile, _round_up(B, 8))
    B_pad = _round_up(B, TB)
    if B_pad != B:
        rows = [jnp.pad(r, ((0, B_pad - B), (0, 0))) for r in rows]

    weights = (params["w1_rep"], params["w1_aware"], params["w1_task"],
               params["w1_nbr"], params["w1_mask"], params["b1"],
               params["w2"], params["b2"], params["w_head"], params["b_head"],
               params["seg"], params["place"], params["base"])

    def row_spec(r):
        return pl.BlockSpec((TB, r.shape[1]), lambda i: (i, 0))

    def full_spec(w):
        # Constant index_map -> same block every grid step -> the weight is
        # DMA'd into VMEM once and stays resident for the whole batch.
        return pl.BlockSpec(w.shape, lambda i: (0, 0))

    out = pl.pallas_call(
        functools.partial(_actor_kernel, device_num=D),
        out_shape=jax.ShapeDtypeStruct((B_pad, HEAD_PAD), jnp.float32),
        grid=(B_pad // TB,),
        in_specs=[row_spec(r) for r in rows] + [full_spec(w) for w in weights],
        out_specs=pl.BlockSpec((TB, HEAD_PAD), lambda i: (i, 0)),
        compiler_params=pltpu.CompilerParams(
            dimension_semantics=("parallel",)),   # both v7x TensorCores split rows
    )(*rows, *weights)

    flat = out[:B, :HEAD]
    masked_offload_probs = flat[:, :D * K].reshape(B, D, K)
    server_probs = flat[:, D * K:].reshape(B, D, 2)
    return masked_offload_probs, server_probs


def multi_actor_forward(params, reputation_matrix, reputation_aware, task_vector,
                        neighbor_matrix, reputation_mask):
    """Single-sample forward matching the PyTorch module's interface."""
    off, srv = multi_actor_forward_batched(
        params,
        reputation_matrix[None], reputation_aware[None], task_vector[None],
        neighbor_matrix[None], reputation_mask[None])
    return off[0], srv[0]


if __name__ == "__main__":
    device_num = 4
    neighbors_num = 3

    key = jax.random.PRNGKey(0)
    kp, k1, k2, k3, k4, k5 = jax.random.split(key, 6)

    params = init_params(kp, device_num, neighbors_num)

    # ---- single-sample forward (original module semantics) ------------------
    reputation_matrix = jax.random.uniform(k1, (device_num, device_num), jnp.float32)
    reputation_aware = jax.random.uniform(k2, (32,), jnp.float32)
    task_vector = jax.random.uniform(k3, (device_num,), jnp.float32)
    neighbor_matrix = jax.random.randint(
        k4, (device_num, neighbors_num), 0, device_num).astype(jnp.float32)
    reputation_mask = jax.random.bernoulli(
        k5, 0.7, (device_num,)).astype(jnp.float32)

    off, srv = multi_actor_forward(params, reputation_matrix, reputation_aware,
                                   task_vector, neighbor_matrix, reputation_mask)
    jax.block_until_ready((off, srv))
    assert off.shape == (device_num, neighbors_num + 2)
    assert srv.shape == (device_num, 2)

    # ---- batched forward (amortizes weight DMA / launch across B rows) ------
    B = 5
    kb1, kb2, kb3, kb4, kb5 = jax.random.split(key, 5)
    rep_b = jax.random.uniform(kb1, (B, device_num, device_num), jnp.float32)
    aware_b = jax.random.uniform(kb2, (B, 32), jnp.float32)
    task_b = jax.random.uniform(kb3, (B, device_num), jnp.float32)
    nbr_b = jax.random.randint(
        kb4, (B, device_num, neighbors_num), 0, device_num).astype(jnp.float32)
    mask_b = jax.random.bernoulli(
        kb5, 0.7, (B, device_num)).astype(jnp.float32)

    off_b, srv_b = multi_actor_forward_batched(params, rep_b, aware_b, task_b,
                                               nbr_b, mask_b)
    jax.block_until_ready((off_b, srv_b))
    assert off_b.shape == (B, device_num, neighbors_num + 2)
    assert srv_b.shape == (B, device_num, 2)

    print("KERNEL_OK")
</pallas_src>

<mosaic_0001>
module attributes {stable_mosaic.version = 11 : i64} {
  func.func @_actor_kernel(%arg0: i32, %arg1: memref<8x16xf32, #tpu.memory_space<vmem>>, %arg2: memref<8x32xf32, #tpu.memory_space<vmem>>, %arg3: memref<8x4xf32, #tpu.memory_space<vmem>>, %arg4: memref<8x12xf32, #tpu.memory_space<vmem>>, %arg5: memref<8x4xf32, #tpu.memory_space<vmem>>, %arg6: memref<16x256xbf16, #tpu.memory_space<vmem>>, %arg7: memref<32x256xbf16, #tpu.memory_space<vmem>>, %arg8: memref<4x256xbf16, #tpu.memory_space<vmem>>, %arg9: memref<12x256xbf16, #tpu.memory_space<vmem>>, %arg10: memref<4x256xbf16, #tpu.memory_space<vmem>>, %arg11: memref<1x256xf32, #tpu.memory_space<vmem>>, %arg12: memref<256x256xbf16, #tpu.memory_space<vmem>>, %arg13: memref<1x256xf32, #tpu.memory_space<vmem>>, %arg14: memref<256x128xbf16, #tpu.memory_space<vmem>>, %arg15: memref<1x128xf32, #tpu.memory_space<vmem>>, %arg16: memref<128x128xbf16, #tpu.memory_space<vmem>>, %arg17: memref<12x128xf32, #tpu.memory_space<vmem>>, %arg18: memref<1x128xf32, #tpu.memory_space<vmem>>, %arg19: memref<8x128xf32, #tpu.memory_space<vmem>>) attributes {dimension_semantics = [#tpu.dimension_semantics<parallel>], iteration_bounds = array<i64: 1>, scalar_prefetch = 0 : i64, scratch_operands = 0 : i64, tpu.core_type = #tpu.core_type<tc>, window_params = [{transform_indices = @transform_0, window_bounds = array<i64: 8, 16>}, {transform_indices = @transform_1, window_bounds = array<i64: 8, 32>}, {transform_indices = @transform_2, window_bounds = array<i64: 8, 4>}, {transform_indices = @transform_3, window_bounds = array<i64: 8, 12>}, {transform_indices = @transform_4, window_bounds = array<i64: 8, 4>}, {pipeline_mode = #tpu.pipeline_mode<synchronous>, transform_indices = @transform_5, window_bounds = array<i64: 16, 256>}, {pipeline_mode = #tpu.pipeline_mode<synchronous>, transform_indices = @transform_6, window_bounds = array<i64: 32, 256>}, {pipeline_mode = #tpu.pipeline_mode<synchronous>, transform_indices = @transform_7, window_bounds = array<i64: 4, 256>}, {pipeline_mode = #tpu.pipeline_mode<synchronous>, transform_indices = @transform_8, window_bounds = array<i64: 12, 256>}, {pipeline_mode = #tpu.pipeline_mode<synchronous>, transform_indices = @transform_9, window_bounds = array<i64: 4, 256>}, {pipeline_mode = #tpu.pipeline_mode<synchronous>, transform_indices = @transform_10, window_bounds = array<i64: 1, 256>}, {pipeline_mode = #tpu.pipeline_mode<synchronous>, transform_indices = @transform_11, window_bounds = array<i64: 256, 256>}, {pipeline_mode = #tpu.pipeline_mode<synchronous>, transform_indices = @transform_12, window_bounds = array<i64: 1, 256>}, {pipeline_mode = #tpu.pipeline_mode<synchronous>, transform_indices = @transform_13, window_bounds = array<i64: 256, 128>}, {pipeline_mode = #tpu.pipeline_mode<synchronous>, transform_indices = @transform_14, window_bounds = array<i64: 1, 128>}, {pipeline_mode = #tpu.pipeline_mode<synchronous>, transform_indices = @transform_15, window_bounds = array<i64: 128, 128>}, {pipeline_mode = #tpu.pipeline_mode<synchronous>, transform_indices = @transform_16, window_bounds = array<i64: 12, 128>}, {pipeline_mode = #tpu.pipeline_mode<synchronous>, transform_indices = @transform_17, window_bounds = array<i64: 1, 128>}, {transform_indices = @transform_18, window_bounds = array<i64: 8, 128>}]} {
    %c0 = arith.constant 0 : index
    %c0_0 = arith.constant 0 : index
    %0 = vector.load %arg1[%c0, %c0_0] : memref<8x16xf32, #tpu.memory_space<vmem>>, vector<8x16xf32>
    %1 = arith.truncf %0 : vector<8x16xf32> to vector<8x16xbf16>
    %c0_1 = arith.constant 0 : index
    %c0_2 = arith.constant 0 : index
    %2 = vector.load %arg6[%c0_1, %c0_2] : memref<16x256xbf16, #tpu.memory_space<vmem>>, vector<16x256xbf16>
    %cst = arith.constant dense<0.000000e+00> : vector<8x256xf32>
    %3 = tpu.matmul %1, %2, %cst {dimension_numbers = #tpu.dot_dimension_numbers<[1], [0], [0], [1], [0, 0, 1, 1], [], []>} : vector<8x16xbf16>, vector<16x256xbf16>, vector<8x256xf32> -> vector<8x256xf32>
    %c0_3 = arith.constant 0 : index
    %c0_4 = arith.constant 0 : index
    %4 = vector.load %arg2[%c0_3, %c0_4] : memref<8x32xf32, #tpu.memory_space<vmem>>, vector<8x32xf32>
    %5 = arith.truncf %4 : vector<8x32xf32> to vector<8x32xbf16>
    %c0_5 = arith.constant 0 : index
    %c0_6 = arith.constant 0 : index
    %6 = vector.load %arg7[%c0_5, %c0_6] : memref<32x256xbf16, #tpu.memory_space<vmem>>, vector<32x256xbf16>
    %cst_7 = arith.constant dense<0.000000e+00> : vector<8x256xf32>
    %7 = tpu.matmul %5, %6, %cst_7 {dimension_numbers = #tpu.dot_dimension_numbers<[1], [0], [0], [1], [0, 0, 1, 1], [], []>} : vector<8x32xbf16>, vector<32x256xbf16>, vector<8x256xf32> -> vector<8x256xf32>
    %8 = arith.addf %3, %7 : vector<8x256xf32>
    %c0_8 = arith.constant 0 : index
    %c0_9 = arith.constant 0 : index
    %9 = vector.load %arg3[%c0_8, %c0_9] : memref<8x4xf32, #tpu.memory_space<vmem>>, vector<8x4xf32>
    %10 = arith.truncf %9 : vector<8x4xf32> to vector<8x4xbf16>
    %c0_10 = arith.constant 0 : index
    %c0_11 = arith.constant 0 : index
    %11 = vector.load %arg8[%c0_10, %c0_11] : memref<4x256xbf16, #tpu.memory_space<vmem>>, vector<4x256xbf16>
    %cst_12 = arith.constant dense<0.000000e+00> : vector<8x256xf32>
    %12 = tpu.matmul %10, %11, %cst_12 {dimension_numbers = #tpu.dot_dimension_numbers<[1], [0], [0], [1], [0, 0, 1, 1], [], []>} : vector<8x4xbf16>, vector<4x256xbf16>, vector<8x256xf32> -> vector<8x256xf32>
    %13 = arith.addf %8, %12 : vector<8x256xf32>
    %c0_13 = arith.constant 0 : index
    %c0_14 = arith.constant 0 : index
    %14 = vector.load %arg4[%c0_13, %c0_14] : memref<8x12xf32, #tpu.memory_space<vmem>>, vector<8x12xf32>
    %15 = arith.truncf %14 : vector<8x12xf32> to vector<8x12xbf16>
    %c0_15 = arith.constant 0 : index
    %c0_16 = arith.constant 0 : index
    %16 = vector.load %arg9[%c0_15, %c0_16] : memref<12x256xbf16, #tpu.memory_space<vmem>>, vector<12x256xbf16>
    %cst_17 = arith.constant dense<0.000000e+00> : vector<8x256xf32>
    %17 = tpu.matmul %15, %16, %cst_17 {dimension_numbers = #tpu.dot_dimension_numbers<[1], [0], [0], [1], [0, 0, 1, 1], [], []>} : vector<8x12xbf16>, vector<12x256xbf16>, vector<8x256xf32> -> vector<8x256xf32>
    %18 = arith.addf %13, %17 : vector<8x256xf32>
    %c0_18 = arith.constant 0 : index
    %c0_19 = arith.constant 0 : index
    %19 = vector.load %arg5[%c0_18, %c0_19] : memref<8x4xf32, #tpu.memory_space<vmem>>, vector<8x4xf32>
    %20 = arith.truncf %19 : vector<8x4xf32> to vector<8x4xbf16>
    %c0_20 = arith.constant 0 : index
    %c0_21 = arith.constant 0 : index
    %21 = vector.load %arg10[%c0_20, %c0_21] : memref<4x256xbf16, #tpu.memory_space<vmem>>, vector<4x256xbf16>
    %cst_22 = arith.constant dense<0.000000e+00> : vector<8x256xf32>
    %22 = tpu.matmul %20, %21, %cst_22 {dimension_numbers = #tpu.dot_dimension_numbers<[1], [0], [0], [1], [0, 0, 1, 1], [], []>} : vector<8x4xbf16>, vector<4x256xbf16>, vector<8x256xf32> -> vector<8x256xf32>
    %23 = arith.addf %18, %22 : vector<8x256xf32>
    %c0_23 = arith.constant 0 : index
    %c0_24 = arith.constant 0 : index
    %24 = vector.load %arg11[%c0_23, %c0_24] : memref<1x256xf32, #tpu.memory_space<vmem>>, vector<1x256xf32>
    %25 = vector.broadcast %24 : vector<1x256xf32> to vector<8x256xf32>
    %26 = arith.addf %23, %25 : vector<8x256xf32>
    %cst_25 = arith.constant 0.000000e+00 : f32
    %27 = vector.broadcast %cst_25 : f32 to vector<8x256xf32>
    %28 = arith.maximumf %26, %27 : vector<8x256xf32>
    %29 = arith.truncf %28 : vector<8x256xf32> to vector<8x256xbf16>
    %c0_26 = arith.constant 0 : index
    %c0_27 = arith.constant 0 : index
    %30 = vector.load %arg12[%c0_26, %c0_27] : memref<256x256xbf16, #tpu.memory_space<vmem>>, vector<256x256xbf16>
    %cst_28 = arith.constant dense<0.000000e+00> : vector<8x256xf32>
    %31 = tpu.matmul %29, %30, %cst_28 {dimension_numbers = #tpu.dot_dimension_numbers<[1], [0], [0], [1], [0, 0, 1, 1], [], []>} : vector<8x256xbf16>, vector<256x256xbf16>, vector<8x256xf32> -> vector<8x256xf32>
    %c0_29 = arith.constant 0 : index
    %c0_30 = arith.constant 0 : index
    %32 = vector.load %arg13[%c0_29, %c0_30] : memref<1x256xf32, #tpu.memory_space<vmem>>, vector<1x256xf32>
    %33 = vector.broadcast %32 : vector<1x256xf32> to vector<8x256xf32>
    %34 = arith.addf %31, %33 : vector<8x256xf32>
    %cst_31 = arith.constant 0.000000e+00 : f32
    %35 = vector.broadcast %cst_31 : f32 to vector<8x256xf32>
    %36 = arith.maximumf %34, %35 : vector<8x256xf32>
    %37 = arith.truncf %36 : vector<8x256xf32> to vector<8x256xbf16>
    %c0_32 = arith.constant 0 : index
    %c0_33 = arith.constant 0 : index
    %38 = vector.load %arg14[%c0_32, %c0_33] : memref<256x128xbf16, #tpu.memory_space<vmem>>, vector<256x128xbf16>
    %cst_34 = arith.constant dense<0.000000e+00> : vector<8x128xf32>
    %39 = tpu.matmul %37, %38, %cst_34 {dimension_numbers = #tpu.dot_dimension_numbers<[1], [0], [0], [1], [0, 0, 1, 1], [], []>} : vector<8x256xbf16>, vector<256x128xbf16>, vector<8x128xf32> -> vector<8x128xf32>
    %c0_35 = arith.constant 0 : index
    %c0_36 = arith.constant 0 : index
    %40 = vector.load %arg15[%c0_35, %c0_36] : memref<1x128xf32, #tpu.memory_space<vmem>>, vector<1x128xf32>
    %41 = vector.broadcast %40 : vector<1x128xf32> to vector<8x128xf32>
    %42 = arith.addf %39, %41 : vector<8x128xf32>
    %c0_37 = arith.constant 0 : index
    %c0_38 = arith.constant 0 : index
    %43 = vector.load %arg5[%c0_37, %c0_38] : memref<8x4xf32, #tpu.memory_space<vmem>>, vector<8x4xf32>
    %c0_39 = arith.constant 0 : index
    %c0_40 = arith.constant 0 : index
    %44 = vector.load %arg4[%c0_39, %c0_40] : memref<8x12xf32, #tpu.memory_space<vmem>>, vector<8x12xf32>
    %45 = math.floor %44 : vector<8x12xf32>
    %cst_41 = arith.constant 0.000000e+00 : f32
    %46 = vector.broadcast %cst_41 : f32 to vector<8x12xf32>
    %cst_42 = arith.constant 0.000000e+00 : f32
    %47 = vector.broadcast %cst_42 : f32 to vector<8x12xf32>
    %48 = arith.cmpf oeq, %45, %47 : vector<8x12xf32>
    %49 = vector.extract_strided_slice %43 {offsets = [0, 0], sizes = [8, 1], strides = [1, 1]} : vector<8x4xf32> to vector<8x1xf32>
    %cst_43 = arith.constant 0.000000e+00 : f32
    %50 = vector.shape_cast %49 : vector<8x1xf32> to vector<8x1xf32>
    %51 = vector.broadcast %50 : vector<8x1xf32> to vector<8x12xf32>
    %52 = vector.broadcast %cst_43 : f32 to vector<8x12xf32>
    %53 = arith.select %48, %51, %52 : vector<8x12xi1>, vector<8x12xf32>
    %54 = arith.addf %46, %53 : vector<8x12xf32>
    %cst_44 = arith.constant 1.000000e+00 : f32
    %55 = vector.broadcast %cst_44 : f32 to vector<8x12xf32>
    %56 = arith.cmpf oeq, %45, %55 : vector<8x12xf32>
    %57 = vector.extract_strided_slice %43 {offsets = [0, 1], sizes = [8, 1], strides = [1, 1]} : vector<8x4xf32> to vector<8x1xf32>
    %cst_45 = arith.constant 0.000000e+00 : f32
    %58 = vector.shape_cast %57 : vector<8x1xf32> to vector<8x1xf32>
    %59 = vector.broadcast %58 : vector<8x1xf32> to vector<8x12xf32>
    %60 = vector.broadcast %cst_45 : f32 to vector<8x12xf32>
    %61 = arith.select %56, %59, %60 : vector<8x12xi1>, vector<8x12xf32>
    %62 = arith.addf %54, %61 : vector<8x12xf32>
    %cst_46 = arith.constant 2.000000e+00 : f32
    %63 = vector.broadcast %cst_46 : f32 to vector<8x12xf32>
    %64 = arith.cmpf oeq, %45, %63 : vector<8x12xf32>
    %65 = vector.extract_strided_slice %43 {offsets = [0, 2], sizes = [8, 1], strides = [1, 1]} : vector<8x4xf32> to vector<8x1xf32>
    %cst_47 = arith.constant 0.000000e+00 : f32
    %66 = vector.shape_cast %65 : vector<8x1xf32> to vector<8x1xf32>
    %67 = vector.broadcast %66 : vector<8x1xf32> to vector<8x12xf32>
    %68 = vector.broadcast %cst_47 : f32 to vector<8x12xf32>
    %69 = arith.select %64, %67, %68 : vector<8x12xi1>, vector<8x12xf32>
    %70 = arith.addf %62, %69 : vector<8x12xf32>
    %cst_48 = arith.constant 3.000000e+00 : f32
    %71 = vector.broadcast %cst_48 : f32 to vector<8x12xf32>
    %72 = arith.cmpf oeq, %45, %71 : vector<8x12xf32>
    %73 = vector.extract_strided_slice %43 {offsets = [0, 3], sizes = [8, 1], strides = [1, 1]} : vector<8x4xf32> to vector<8x1xf32>
    %cst_49 = arith.constant 0.000000e+00 : f32
    %74 = vector.shape_cast %73 : vector<8x1xf32> to vector<8x1xf32>
    %75 = vector.broadcast %74 : vector<8x1xf32> to vector<8x12xf32>
    %76 = vector.broadcast %cst_49 : f32 to vector<8x12xf32>
    %77 = arith.select %72, %75, %76 : vector<8x12xi1>, vector<8x12xf32>
    %78 = arith.addf %70, %77 : vector<8x12xf32>
    %c0_50 = arith.constant 0 : index
    %c0_51 = arith.constant 0 : index
    %79 = vector.load %arg17[%c0_50, %c0_51] : memref<12x128xf32, #tpu.memory_space<vmem>>, vector<12x128xf32>
    %cst_52 = arith.constant dense<0.000000e+00> : vector<8x128xf32>
    %80 = tpu.matmul %78, %79, %cst_52 {dimension_numbers = #tpu.dot_dimension_numbers<[1], [0], [0], [1], [0, 0, 1, 1], [], []>} : vector<8x12xf32>, vector<12x128xf32>, vector<8x128xf32> -> vector<8x128xf32>
    %c0_53 = arith.constant 0 : index
    %c0_54 = arith.constant 0 : index
    %81 = vector.load %arg18[%c0_53, %c0_54] : memref<1x128xf32, #tpu.memory_space<vmem>>, vector<1x128xf32>
    %82 = vector.broadcast %81 : vector<1x128xf32> to vector<8x128xf32>
    %83 = arith.addf %80, %82 : vector<8x128xf32>
    %cst_55 = arith.constant dense<0xFF800000> : vector<8xf32>
    %84 = vector.multi_reduction <maximumf>, %42, %cst_55 [1] : vector<8x128xf32> to vector<8xf32>
    %85 = vector.shape_cast %84 : vector<8xf32> to vector<8x1xf32>
    %86 = vector.broadcast %85 : vector<8x1xf32> to vector<8x128xf32>
    %87 = arith.subf %42, %86 : vector<8x128xf32>
    %88 = math.exp %87 : vector<8x128xf32>
    %89 = arith.mulf %88, %83 : vector<8x128xf32>
    %90 = arith.truncf %89 : vector<8x128xf32> to vector<8x128xbf16>
    %c0_56 = arith.constant 0 : index
    %c0_57 = arith.constant 0 : index
    %91 = vector.load %arg16[%c0_56, %c0_57] : memref<128x128xbf16, #tpu.memory_space<vmem>>, vector<128x128xbf16>
    %cst_58 = arith.constant dense<0.000000e+00> : vector<8x128xf32>
    %92 = tpu.matmul %90, %91, %cst_58 {dimension_numbers = #tpu.dot_dimension_numbers<[1], [0], [0], [1], [0, 0, 1, 1], [], []>} : vector<8x128xbf16>, vector<128x128xbf16>, vector<8x128xf32> -> vector<8x128xf32>
    %cst_59 = arith.constant 1.000000e-30 : f32
    %93 = vector.broadcast %cst_59 : f32 to vector<8x128xf32>
    %94 = arith.maximumf %92, %93 : vector<8x128xf32>
    %95 = tpu.reciprocal %94 {approx = true} : vector<8x128xf32> -> vector<8x128xf32>
    %96 = arith.mulf %89, %95 : vector<8x128xf32>
    %c0_60 = arith.constant 0 : index
    %c0_61 = arith.constant 0 : index
    %97 = vector.load %arg19[%c0_60, %c0_61] : memref<8x128xf32, #tpu.memory_space<vmem>>, vector<8x128xf32>
    tpu.vector_store %arg19[%c0_60, %c0_61], %96 {strides = array<i32>} : memref<8x128xf32, #tpu.memory_space<vmem>>, vector<8x128xf32>,
    return
  }
  func.func @transform_0(%arg0: i32) -> (i32, i32) {
    %c0_i32 = arith.constant 0 : i32
    %c0_i32_0 = arith.constant 0 : i32
    return %arg0, %c0_i32 : i32, i32
  }
  func.func @transform_1(%arg0: i32) -> (i32, i32) {
    %c0_i32 = arith.constant 0 : i32
    %c0_i32_0 = arith.constant 0 : i32
    return %arg0, %c0_i32 : i32, i32
  }
  func.func @transform_2(%arg0: i32) -> (i32, i32) {
    %c0_i32 = arith.constant 0 : i32
    %c0_i32_0 = arith.constant 0 : i32
    return %arg0, %c0_i32 : i32, i32
  }
  func.func @transform_3(%arg0: i32) -> (i32, i32) {
    %c0_i32 = arith.constant 0 : i32
    %c0_i32_0 = arith.constant 0 : i32
    return %arg0, %c0_i32 : i32, i32
  }
  func.func @transform_4(%arg0: i32) -> (i32, i32) {
    %c0_i32 = arith.constant 0 : i32
    %c0_i32_0 = arith.constant 0 : i32
    return %arg0, %c0_i32 : i32, i32
  }
  func.func @transform_5(%arg0: i32) -> (i32, i32) {
    %c0_i32 = arith.constant 0 : i32
    %c0_i32_0 = arith.constant 0 : i32
    %c0_i32_1 = arith.constant 0 : i32
    return %c0_i32, %c0_i32_0 : i32, i32
  }
  func.func @transform_6(%arg0: i32) -> (i32, i32) {
    %c0_i32 = arith.constant 0 : i32
    %c0_i32_0 = arith.constant 0 : i32
    %c0_i32_1 = arith.constant 0 : i32
    return %c0_i32, %c0_i32_0 : i32, i32
  }
  func.func @transform_7(%arg0: i32) -> (i32, i32) {
    %c0_i32 = arith.constant 0 : i32
    %c0_i32_0 = arith.constant 0 : i32
    %c0_i32_1 = arith.constant 0 : i32
    return %c0_i32, %c0_i32_0 : i32, i32
  }
  func.func @transform_8(%arg0: i32) -> (i32, i32) {
    %c0_i32 = arith.constant 0 : i32
    %c0_i32_0 = arith.constant 0 : i32
    %c0_i32_1 = arith.constant 0 : i32
    return %c0_i32, %c0_i32_0 : i32, i32
  }
  func.func @transform_9(%arg0: i32) -> (i32, i32) {
    %c0_i32 = arith.constant 0 : i32
    %c0_i32_0 = arith.constant 0 : i32
    %c0_i32_1 = arith.constant 0 : i32
    return %c0_i32, %c0_i32_0 : i32, i32
  }
  func.func @transform_10(%arg0: i32) -> (i32, i32) {
    %c0_i32 = arith.constant 0 : i32
    %c0_i32_0 = arith.constant 0 : i32
    %c0_i32_1 = arith.constant 0 : i32
    return %c0_i32, %c0_i32_0 : i32, i32
  }
  func.func @transform_11(%arg0: i32) -> (i32, i32) {
    %c0_i32 = arith.constant 0 : i32
    %c0_i32_0 = arith.constant 0 : i32
    %c0_i32_1 = arith.constant 0 : i32
    return %c0_i32, %c0_i32_0 : i32, i32
  }
  func.func @transform_12(%arg0: i32) -> (i32, i32) {
    %c0_i32 = arith.constant 0 : i32
    %c0_i32_0 = arith.constant 0 : i32
    %c0_i32_1 = arith.constant 0 : i32
    return %c0_i32, %c0_i32_0 : i32, i32
  }
  func.func @transform_13(%arg0: i32) -> (i32, i32) {
    %c0_i32 = arith.constant 0 : i32
    %c0_i32_0 = arith.constant 0 : i32
    %c0_i32_1 = arith.constant 0 : i32
    return %c0_i32, %c0_i32_0 : i32, i32
  }
  func.func @transform_14(%arg0: i32) -> (i32, i32) {
    %c0_i32 = arith.constant 0 : i32
    %c0_i32_0 = arith.constant 0 : i32
    %c0_i32_1 = arith.constant 0 : i32
    return %c0_i32, %c0_i32_0 : i32, i32
  }
  func.func @transform_15(%arg0: i32) -> (i32, i32) {
    %c0_i32 = arith.constant 0 : i32
    %c0_i32_0 = arith.constant 0 : i32
    %c0_i32_1 = arith.constant 0 : i32
    return %c0_i32, %c0_i32_0 : i32, i32
  }
  func.func @transform_16(%arg0: i32) -> (i32, i32) {
    %c0_i32 = arith.constant 0 : i32
    %c0_i32_0 = arith.constant 0 : i32
    %c0_i32_1 = arith.constant 0 : i32
    return %c0_i32, %c0_i32_0 : i32, i32
  }
  func.func @transform_17(%arg0: i32) -> (i32, i32) {
    %c0_i32 = arith.constant 0 : i32
    %c0_i32_0 = arith.constant 0 : i32
    %c0_i32_1 = arith.constant 0 : i32
    return %c0_i32, %c0_i32_0 : i32, i32
  }
  func.func @transform_18(%arg0: i32) -> (i32, i32) {
    %c0_i32 = arith.constant 0 : i32
    %c0_i32_0 = arith.constant 0 : i32
    return %arg0, %c0_i32 : i32, i32
  }
}

</mosaic_0001>

<bundles_post_ra>
// kernel: multi_actor_forward_batched.1
= control target key start
LH: loop header
LB: loop body
LE: loop exit
PB: predicated region body
PF: predicated region fallthrough
CT: control target
= control target key end

     0   :  { %s1677_s0 = inlined_call_operand.vmem [shape: f32[8,16], index: 0, kind: input, shape index: {}]   ;;  %s1678_s1 = inlined_call_operand.vmem [shape: f32[8,32], index: 1, kind: input, shape index: {}]   ;;  %s1679_s2 = inlined_call_operand.vmem [shape: f32[8,4], index: 2, kind: input, shape index: {}]   ;;  %s1680_s3 = inlined_call_operand.vmem [shape: f32[8,12], index: 3, kind: input, shape index: {}]   ;;  %s1681_s4 = inlined_call_operand.vmem [shape: f32[8,4], index: 4, kind: input, shape index: {}]   ;;  %s1682_s5 = inlined_call_operand.vmem [shape: bf16[16,256], index: 5, kind: input, shape index: {}]   ;;  %s1683_s6 = inlined_call_operand.vmem [shape: bf16[32,256], index: 6, kind: input, shape index: {}]   ;;  %s1684_s7 = inlined_call_operand.vmem [shape: bf16[4,256], index: 7, kind: input, shape index: {}]   ;;  %s1685_s8 = inlined_call_operand.hbm [shape: bf16[12,256], index: 8, kind: input, shape index: {}]   ;;  %s1686_s9 = inlined_call_operand.vmem [shape: bf16[4,256], index: 9, kind: input, shape index: {}]   ;;  %s1687_s10 = inlined_call_operand.vmem [shape: f32[1,256], index: 10, kind: input, shape index: {}]   ;;  %s1688_s11 = inlined_call_operand.hbm [shape: bf16[256,256], index: 11, kind: input, shape index: {}]   ;;  %s1689_s12 = inlined_call_operand.vmem [shape: f32[1,256], index: 12, kind: input, shape index: {}]   ;;  %s1690_s13 = inlined_call_operand.hbm [shape: bf16[256,128], index: 13, kind: input, shape index: {}]   ;;  %s1691_s14 = inlined_call_operand.vmem [shape: f32[1,128], index: 14, kind: input, shape index: {}]   ;;  %s1692_s15 = inlined_call_operand.hbm [shape: bf16[128,128], index: 15, kind: input, shape index: {}]   ;;  %s1693_s16 = inlined_call_operand.hbm [shape: f32[12,128], index: 16, kind: input, shape index: {}]   ;;  %s1694_s17 = inlined_call_operand.vmem [shape: f32[1,128], index: 17, kind: input, shape index: {}]   ;;  %s1695_s18 = inlined_call_operand.vmem [shape: f32[8,128], index: 18, kind: output, shape index: {}]  }
   0x1   :  { %1698 = sst [smem:[#allocation13_spill]] %s1677_s0 }
   0x2   :  { %1699 = sst [smem:[#allocation14_spill]] %s1678_s1 }
   0x3   :  { %1700 = sst [smem:[#allocation15_spill]] %s1679_s2 }
   0x4   :  { %23 = vsyncpa [#allocation3], 0 }
   0x5   :  { %24 = vsyncpa [#allocation5], 0 }
   0x6   :  { %25 = vsyncpa [#allocation8], 0  ;;  %s63_s29 = sshll.u32 %s1688_s11, 4  ;;  %s1439_s30 = smov [#allocation4]   ;;  %s64_s29 = int_to_ptr.hbm [resolvable:$true] %s63_s29 }
   0x7   :  { %s65_s0 = sshll.u32 %s1439_s30, 4  ;;  %s1696_s19 = smov 128   ;;  %s66_s0 = int_to_ptr.vmem [resolvable:$true] %s65_s0 }
   0x8   :  { %s1441_s1 = smov 8   ;;  %s93_s22 = sshll.u32 %s1692_s15, 4  ;;  %s94_s22 = int_to_ptr.hbm [resolvable:$true] %s93_s22 }
   0x9   :  { %71 = dma.hbm_to_vmem [thread:$0]  %s64_s29, 4096, %s66_s0, [#allocation5], %s1696_s19, %s1696_s19, %s1441_s1  }
   0xa   :  { %s1442_s2 = smov [#allocation7]   ;;  %s46_s11 = sshll.u32 %s1685_s8, 4  ;;  %s47_s11 = int_to_ptr.hbm [resolvable:$true] %s46_s11 }
   0xb   :  { %s95_s23 = sshll.u32 %s1442_s2, 4  ;;  %s1443_s26 = smov 64   ;;  %s96_s23 = int_to_ptr.vmem [resolvable:$true] %s95_s23 }
   0xc   :  { %s1444_s27 = smov 4   ;;  %s78_s29 = sshll.u32 %s1690_s13, 4  ;;  %s79_s29 = int_to_ptr.hbm [resolvable:$true] %s78_s29 }
   0xd   :  { %101 = dma.hbm_to_vmem [thread:$0]  %s94_s22, 1024, %s96_s23, [#allocation8], %s1443_s26, %s1443_s26, %s1444_s27  }
   0xe   :  { %s1445_s0 = smov [#allocation2]   ;;  %s1701_s15 = smov 128  }
   0xf   :  { %s48_s19 = sshll.u32 %s1445_s0, 4  ;;  %s1446_s20 = smov [#allocation6]   ;;  %s49_s19 = int_to_ptr.vmem [resolvable:$true] %s48_s19 }
  0x10   :  { %54 = dma.hbm_to_vmem [thread:$0]  %s47_s11, 256, %s49_s19, [#allocation3], %s1701_s15, %s1701_s15, %s1441_s1  }
  0x11   :  { %s80_s21 = sshll.u32 %s1446_s20, 4  ;;  %s106_s24 = sshll.u32 %s1693_s16, 4  ;;  %s81_s21 = int_to_ptr.vmem [resolvable:$true] %s80_s21  ;;  %s107_s24 = int_to_ptr.hbm [resolvable:$true] %s106_s24 }
  0x12   :  { %86 = dma.hbm_to_vmem [thread:$0]  %s79_s29, 2048, %s81_s21, [#allocation5], %s1443_s26, %s1443_s26, %s1444_s27  }
  0x13   :  { %s1447_s22 = smov [#allocation9]  }
  0x14   :  { %s108_s23 = sshll.u32 %s1447_s22, 4  ;;  %s109_s23 = int_to_ptr.vmem [resolvable:$true] %s108_s23 }
  0x15   :  { %114 = dma.hbm_to_vmem [thread:$0]  %s107_s24, 256, %s109_s23, [#allocation8], %s1701_s15, %s1701_s15, %s1441_s1  }
  0x16   :  { %1433 = dma.done.wait [#allocation3], 256  }
  0x17   :  { %1434 = vsyncadd [#allocation3], 4294967040 }
  0x18   :  { %1435 = dma.done.wait [#allocation5], 6144  }
  0x19   :  { %1436 = vsyncadd [#allocation5], 4294961152 }
  0x1a   :  { %1437 = dma.done.wait [#allocation8], 1280  }
  0x1b   :  { %1438 = vsyncadd [#allocation8], 4294966016  ;;  %v977_v0 = vld [vmem:[%s1682_s5] sm:$0xf]  ;;  %v1226_v1 = vld [vmem:[%s1682_s5 + $0x4] sm:$0xf0] }
  0x1c   :  { %v967_v2 = vld [vmem:[%s1683_s6 + $0x10] sm:$0xf]  ;;  %v978_v3 = vor.u32 %v1226_v1, %v977_v0  ;;  %v1230_v4 = vld [vmem:[%s1683_s6 + $0x14] sm:$0xf0]  ;;  %s1702_s29 = sld [smem:[#allocation13_spill]]  ;;  %vm208_vm0 = vcmask 130048  }
  0x1d   :  { %v1225_v6 = vld [vmem:[%s1682_s5 + $0x4] sm:$0xf]  ;;  %v968_v7 = vor.u32 %v1230_v4, %v967_v2  ;;  %v979_v9 = vld [vmem:[%s1682_s5 + $0x8] sm:$0xf0]  ;;  %v959_v10 = vld [vmem:[%s1683_s6] sm:$0xf] }
  0x1e   :  { %v1228_v11 = vld [vmem:[%s1683_s6 + $0x4] sm:$0xf0]  ;;  %219 = vmatpush.bf16.msra.mxu2 %v978_v3  ;;  %v982_v12 = vor.u32 %v1225_v6, %v979_v9  ;;  %v1229_v13 = vld [vmem:[%s1683_s6 + $0x14] sm:$0xf]  ;;  %v969_v14 = vld [vmem:[%s1683_s6 + $0x18] sm:$0xf0] }
  0x1f   :  { %v240_v15 = vld [vmem:[%s1684_s7] sm:$0xf]  ;;  %178 = vmatpush.bf16.msra.mxu0 %v968_v7  ;;  %v960_v16 = vor.u32 %v1228_v11, %v959_v10  ;;  %v972_v17 = vor.u32 %v1229_v13, %v969_v14  ;;  %s1703_s1 = sld [smem:[#allocation14_spill]]  ;;  %v1227_v19 = vld [vmem:[%s1683_s6 + $0x4] sm:$0xf]  ;;  %vm298_vm1 = vcmask 1045504  }
  0x20   :  { %242 = vst [vmem:[#allocation1] ss:$4 sm:$0xff] %v240_v15  ;;  %v961_v20 = vld [vmem:[%s1683_s6 + $0x8] sm:$0xf0]  ;;  %v991_v23 = vld [vmem:[#allocation2 + $0x8] sm:$0x30] }
  0x21   :  { %v1231_v21 = vld [vmem:[#allocation2 + $0x4] sm:$0xf]  ;;  %191 = vmatpush.bf16.msra.mxu1 %v972_v17  ;;  %v964_v22 = vor.u32 %v1227_v19, %v961_v20  ;;  %v989_v26 = vld [vmem:[#allocation2] sm:$0xf]  ;;  %v1232_v27 = vld [vmem:[#allocation2 + $0x4] sm:$0x30] }
  0x22   :  { %v138_v5 = vld [vmem:[%s1702_s29] sm:$0xff]  ;;  %232 = vmatpush.bf16.msrb.mxu2 %v982_v12  ;;  %v994_v25 = vor.u32 %v1231_v21, %v991_v23  ;;  %vm168_vm2 = vcmask 261120   ;;  %v990_v28 = vor.u32 %v1232_v27, %v989_v26  ;;  %vm249_vm3 = vcmask 1041408   ;;  %s1704_s15 = sld [smem:[#allocation15_spill]]  ;;  %v1121_v46 = vld [vmem:[#allocation4 + $0xf0] sm:$0xf] }
  0x23   :  { %v139_v8 = vpack.c.bf16 %v138_v5, %v138_v5  ;;  %179 = vmatpush.bf16.msra.mxu0 %v960_v16  ;;  %v335_v30 = vld [vmem:[%s1686_s9] sm:$0xf]  ;;  %vm245_vm4 = vcmask 31744   ;;  %vm294_vm5 = vcmask 97280   ;;  %v1264_v47 = vld [vmem:[#allocation4 + $0xf4] sm:$0xf0] }
  0x24   :  { %v303_v31 = vsel %vm298_vm1, %v994_v25, 0  ;;  %v300_v32 = vsel %vm298_vm1, %v990_v28, 0  ;;  %v1634_v42 = vld [vmem:[%s1680_s3] sm:$0xff]  ;;  %v1263_v48 = vld [vmem:[#allocation4 + $0xf4] sm:$0xf]  ;;  %v1122_v49 = vor.u32 %v1264_v47, %v1121_v46  ;;  %vm838_vm6 = vcmask 1043456  }
  0x25   :  { %v142_v18 = vld [vmem:[%s1703_s1] sm:$0xff]  ;;  %983 = vmatmul.msk.bf16.vlgmr.msra.gmra.mxu2 %vm208_vm0, %v139_v8  ;;  %192 = vmatpush.bf16.msra.mxu1 %v964_v22  ;;  %v283_v44 = vpack.c.bf16 %v1634_v42, %v1634_v42  ;;  %v1123_v50 = vld [vmem:[#allocation4 + $0xf8] sm:$0xf0]  ;;  %v1113_v51 = vld [vmem:[#allocation4 + $0xe0] sm:$0xf] }
  0x26   :  { %v143_v24 = vpack.c.bf16 %v142_v18, %v142_v18  ;;  %v1639_v43 = vld [vmem:[%s1681_s4] sm:$0xff]  ;;  %v1126_v53 = vor.u32 %v1263_v48, %v1123_v50  ;;  %v1261_v54 = vld [vmem:[#allocation4 + $0xe4] sm:$0xf]  ;;  %v1105_v58 = vld [vmem:[#allocation4 + $0xd0] sm:$0xf] }
  0x27   :  { %v244_v33 = vld.sshfl [vmem:[#allocation1 + $0x8] sm:$0xff pattern:$0x73625140]  ;;  %v243_v34 = vld.sshfl [vmem:[#allocation1] sm:$0xff pattern:$0x73625140]  ;;  %312 = vmatpush.bf16.msrb.mxu0 %v300_v32  ;;  %v334_v45 = vpack.c.bf16 %v1639_v43, %v1639_v43 }
  0x28   :  { %v238_v29 = vld [vmem:[%s1704_s15] sm:$0xff]  ;;  %973 = vmatmul.msk.bf16.vlgmr.msra.gmra.mxu0 %vm168_vm2, %v143_v24  ;;  %v252_v35 = vsel %vm249_vm3, %v244_v33, 0  ;;  %v250_v37 = vsel %vm249_vm3, %v243_v34, 0  ;;  %337 = vst [vmem:[#allocation1] ss:$4 sm:$0xff] %v335_v30  ;;  %974 = vmatmul.msk.bf16.vlgmr.msra.gmra.mxu1 %vm168_vm2, %v143_v24 }
  0x29   :  { %325 = vmatpush.bf16.msrb.mxu1 %v303_v31  ;;  %v239_v36 = vpack.c.bf16 %v238_v29, %v238_v29  ;;  %274 = vmatpush.bf16.msra.mxu3 %v252_v35  ;;  %v1262_v52 = vld [vmem:[#allocation4 + $0xe4] sm:$0xf0]  ;;  %v1115_v55 = vld [vmem:[#allocation4 + $0xe8] sm:$0xf0]  ;;  %v1260_v59 = vld [vmem:[#allocation4 + $0xd4] sm:$0xf0] }
  0x2a   :  { %261 = vmatpush.bf16.msra.mxu2 %v250_v37  ;;  %v1114_v56 = vor.u32 %v1262_v52, %v1113_v51  ;;  %v1118_v57 = vor.u32 %v1261_v54, %v1115_v55  ;;  %v1259_v60 = vld [vmem:[#allocation4 + $0xd4] sm:$0xf]  ;;  %v1106_v61 = vor.u32 %v1260_v59, %v1105_v58  ;;  %v1107_v62 = vld [vmem:[#allocation4 + $0xd8] sm:$0xf0]  ;;  %v1097_v63 = vld [vmem:[#allocation4 + $0xc0] sm:$0xf] }
  0x2b   :  { %v1258_v0 = vld [vmem:[#allocation4 + $0xc4] sm:$0xf0]  ;;  %v1110_v1 = vor.u32 %v1259_v60, %v1107_v62  ;;  %v1257_v2 = vld [vmem:[#allocation4 + $0xc4] sm:$0xf]  ;;  %v1099_v3 = vld [vmem:[#allocation4 + $0xc8] sm:$0xf0] }
  0x2c   :  { %986 = vmatmul.msk.bf16.vlgmr.msra.gmra.mxu3 %vm245_vm4, %v239_v36  ;;  %v1098_v4 = vor.u32 %v1258_v0, %v1097_v63  ;;  %v1102_v5 = vor.u32 %v1257_v2, %v1099_v3  ;;  %v1089_v6 = vld [vmem:[#allocation4 + $0xb0] sm:$0xf]  ;;  %v1256_v7 = vld [vmem:[#allocation4 + $0xb4] sm:$0xf0]  ;;  %v1091_v10 = vld [vmem:[#allocation4 + $0xb8] sm:$0xf0] }
  0x2d   :  { %598 = vmatpush.bf16.msra.mxu1 %v1122_v49  ;;  %v1090_v9 = vor.u32 %v1256_v7, %v1089_v6  ;;  %v1081_v12 = vld [vmem:[#allocation4 + $0xa0] sm:$0xf]  ;;  %v1254_v13 = vld [vmem:[#allocation4 + $0xa4] sm:$0xf0]  ;;  %v1253_v14 = vld [vmem:[#allocation4 + $0xa4] sm:$0xf] }
  0x2e   :  { %v1082_v15 = vor.u32 %v1254_v13, %v1081_v12  ;;  %v1083_v16 = vld [vmem:[#allocation4 + $0xa8] sm:$0xf0]  ;;  %v1073_v18 = vld [vmem:[#allocation4 + $0x90] sm:$0xf]  ;;  %v1252_v19 = vld [vmem:[#allocation4 + $0x94] sm:$0xf0] }
  0x2f   :  { %v339_v38 = vld.sshfl [vmem:[#allocation1 + $0x8] sm:$0xff pattern:$0x73625140]  ;;  %v338_v39 = vld.sshfl [vmem:[#allocation1] sm:$0xff pattern:$0x73625140]  ;;  %v1086_v17 = vor.u32 %v1253_v14, %v1083_v16  ;;  %v1074_v21 = vor.u32 %v1252_v19, %v1073_v18 }
  0x30   :  { %v345_v40 = vsel %vm249_vm3, %v339_v38, 0  ;;  %v343_v41 = vsel %vm249_vm3, %v338_v39, 0  ;;  %v1251_v20 = vld [vmem:[#allocation4 + $0x94] sm:$0xf]  ;;  %v1075_v22 = vld [vmem:[#allocation4 + $0x98] sm:$0xf0] }
  0x31   :  { %367 = vmatpush.bf16.msrb.mxu3 %v345_v40  ;;  %599 = vmatpush.bf16.msra.mxu1 %v1114_v56  ;;  %v1057_v23 = vld [vmem:[#allocation4 + $0x70] sm:$0xf]  ;;  %v1078_v24 = vor.u32 %v1251_v20, %v1075_v22  ;;  %v1248_v25 = vld [vmem:[#allocation4 + $0x74] sm:$0xf0]  ;;  %v1247_v26 = vld [vmem:[#allocation4 + $0x74] sm:$0xf] }
  0x32   :  { %v1058_v27 = vor.u32 %v1248_v25, %v1057_v23  ;;  %v1059_v28 = vld [vmem:[#allocation4 + $0x78] sm:$0xf0]  ;;  %v1065_v30 = vld [vmem:[#allocation4 + $0x80] sm:$0xf]  ;;  %v1250_v31 = vld [vmem:[#allocation4 + $0x84] sm:$0xf0] }
  0x33   :  { %v1062_v29 = vor.u32 %v1247_v26, %v1059_v28  ;;  %v1249_v32 = vld [vmem:[#allocation4 + $0x84] sm:$0xf]  ;;  %v1066_v33 = vor.u32 %v1250_v31, %v1065_v30  ;;  %v1067_v34 = vld [vmem:[#allocation4 + $0x88] sm:$0xf0]  ;;  %v1049_v35 = vld [vmem:[#allocation4 + $0x60] sm:$0xf] }
  0x34   :  { %585 = vmatpush.bf16.msra.mxu0 %v1058_v27  ;;  %v1070_v38 = vor.u32 %v1249_v32, %v1067_v34  ;;  %v1245_v40 = vld [vmem:[#allocation4 + $0x64] sm:$0xf]  ;;  %v1041_v47 = vld [vmem:[#allocation4 + $0x50] sm:$0xf]  ;;  %v1244_v48 = vld [vmem:[#allocation4 + $0x54] sm:$0xf0] }
  0x35   :  { %984 = vmatmul.msk.bf16.vlgmr.msrb.gmra.mxu2 %vm208_vm0, %v139_v8  ;;  %624 = vmatpush.bf16.msra.mxu3 %v1126_v53  ;;  %v1255_v8 = vld [vmem:[#allocation4 + $0xb4] sm:$0xf]  ;;  %v1042_v50 = vor.u32 %v1244_v48, %v1041_v47  ;;  %v1043_v51 = vld [vmem:[#allocation4 + $0x58] sm:$0xf0]  ;;  %v1033_v52 = vld [vmem:[#allocation4 + $0x40] sm:$0xf] }
  0x36   :  { %354 = vmatpush.bf16.msrb.mxu2 %v343_v41  ;;  %600 = vmatpush.bf16.msra.mxu1 %v1106_v61  ;;  %v1094_v11 = vor.u32 %v1255_v8, %v1091_v10  ;;  %v1051_v41 = vld [vmem:[#allocation4 + $0x68] sm:$0xf0]  ;;  %v1243_v49 = vld [vmem:[#allocation4 + $0x54] sm:$0xf]  ;;  %v1242_v53 = vld [vmem:[#allocation4 + $0x44] sm:$0xf0] }
  0x37   :  { %v1046_v54 = vor.u32 %v1243_v49, %v1043_v51  ;;  %v1241_v55 = vld [vmem:[#allocation4 + $0x44] sm:$0xf]  ;;  %v1035_v56 = vld [vmem:[#allocation4 + $0x48] sm:$0xf0]  ;;  %v1025_v61 = vld [vmem:[#allocation4 + $0x30] sm:$0xf] }
  0x38   :  { %995 = vmatmul.msk.bf16.vlgmr.msrb.gmra.mxu0 %vm294_vm5, %v283_v44  ;;  %996 = vmatmul.msk.bf16.vlgmr.msrb.gmra.mxu1 %vm294_vm5, %v283_v44  ;;  %v1038_v59 = vor.u32 %v1241_v55, %v1035_v56  ;;  %v1240_v62 = vld [vmem:[#allocation4 + $0x34] sm:$0xf0]  ;;  %v1239_v63 = vld [vmem:[#allocation4 + $0x34] sm:$0xf]  ;;  %v1238_v6 = vld [vmem:[#allocation4 + $0x24] sm:$0xf0] }
  0x39   :  { %625 = vmatpush.bf16.msra.mxu3 %v1118_v57  ;;  %v1034_v57 = vor.u32 %v1242_v53, %v1033_v52  ;;  %v1026_v3 = vor.u32 %v1240_v62, %v1025_v61  ;;  %v1237_v7 = vld [vmem:[#allocation4 + $0x24] sm:$0xf]  ;;  %v1019_v8 = vld [vmem:[#allocation4 + $0x28] sm:$0xf0]  ;;  %v1009_v16 = vld [vmem:[#allocation4 + $0x10] sm:$0xf] }
  0x3a   :  { %601 = vmatpush.bf16.msra.mxu1 %v1098_v4  ;;  %v1235_v18 = vld [vmem:[#allocation4 + $0x14] sm:$0xf]  ;;  %v375_v23 = vld [vmem:[%s1687_s10] sm:$0x3]  ;;  %v1233_v26 = vld [vmem:[#allocation4 + $0x4] sm:$0xf] }
  0x3b   :  { %v1234_v25 = vld [vmem:[#allocation4 + $0x4] sm:$0xf0]  ;;  %v1003_v30 = vld [vmem:[#allocation4 + $0x8] sm:$0xf0]  ;;  %v1279_v61 = vld [vmem:[#allocation6 + $0x70] sm:$0xff] }
  0x3c   :  { %998 = vmatmul.msk.bf16.vlgmr.msrb.gmra.mxu3 %vm245_vm4, %v334_v45  ;;  %v1006_v32 = vor.u32 %v1233_v26, %v1003_v30  ;;  %v1268_v62 = vld [vmem:[#allocation6 + $0x18] sm:$0xff]  ;;  %v829_v30 = vld [vmem:[#allocation9] sm:$0xff] }
  0x3d   :  { %626 = vmatpush.bf16.msra.mxu3 %v1110_v1  ;;  %v1027_v1 = vld [vmem:[#allocation4 + $0x38] sm:$0xf0] }
  0x3e   :  { %602 = vmatpush.bf16.msra.mxu1 %v1090_v9  ;;  %v1030_v4 = vor.u32 %v1239_v63, %v1027_v1  ;;  %v1448_v63 = vmov 0   ;;  %v1277_v1 = vld [vmem:[#allocation6 + $0x60] sm:$0xff] }
  0x3f   :  { %1302 = vset.pattern.permute.xlu0 %v1448_v63 }
  0x40   :  { %803 = vperm.xlu0 %1302, %v1639_v43  }
  0x41   :  { %627 = vmatpush.bf16.msra.mxu3 %v1102_v5  ;;  %v1017_v5 = vld [vmem:[#allocation4 + $0x20] sm:$0xf] }
  0x42   :  { %603 = vmatpush.bf16.msra.mxu1 %v1082_v15  ;;  %v1018_v9 = vor.u32 %v1238_v6, %v1017_v5  ;;  %v1275_v5 = vld [vmem:[#allocation6 + $0x50] sm:$0xff]  ;;  %v1450_v6 = vmov 1  }
  0x45   :  { %985 = vmatmul.msk.bf16.vlgmr.msra.gmra.mxu2 %vm245_vm4, %v239_v36  ;;  %628 = vmatpush.bf16.msra.mxu3 %v1094_v11  ;;  %v1246_v36 = vld [vmem:[#allocation4 + $0x64] sm:$0xf0]  ;;  %v1022_v11 = vor.u32 %v1237_v7, %v1019_v8  ;;  %v1265_v7 = vld [vmem:[#allocation6] sm:$0xff] }
  0x46   :  { %604 = vmatpush.bf16.msra.mxu1 %v1074_v21  ;;  %611 = vmatpush.bf16.msra.mxu2 %v1062_v29  ;;  %v1050_v39 = vor.u32 %v1246_v36, %v1049_v35  ;;  %v1011_v21 = vld [vmem:[#allocation4 + $0x18] sm:$0xf0]  ;;  %v1274_v8 = vld [vmem:[#allocation6 + $0x48] sm:$0xff] }
  0x47   :  { %v1014_v22 = vor.u32 %v1235_v18, %v1011_v21 }
  0x48   :  { %586 = vmatpush.bf16.msra.mxu0 %v1050_v39  ;;  %1303 = vset.pattern.permute.xlu0 %v1450_v6 }
  0x49   :  { %629 = vmatpush.bf16.msra.mxu3 %v1086_v17  ;;  %v1236_v17 = vld [vmem:[#allocation4 + $0x14] sm:$0xf0]  ;;  %810 = vperm.xlu0 %1303, %v1639_v43  }
  0x4a   :  { %605 = vmatpush.bf16.msra.mxu1 %v1066_v33  ;;  %v1010_v20 = vor.u32 %v1236_v17, %v1009_v16  ;;  %v378_v33 = vperm.slane %v375_v23, 1 }
  0x4c   :  { %587 = vmatpush.bf16.msra.mxu0 %v1042_v50  ;;  %v377_v50 = vperm.slane %v375_v23, 0 }
  0x4d   :  { %630 = vmatpush.bf16.msra.mxu3 %v1078_v24  ;;  %v1001_v24 = vld [vmem:[#allocation4] sm:$0xf] }
  0x4e   :  { %v1002_v29 = vor.u32 %v1234_v25, %v1001_v24 }
  0x50   :  { %588 = vmatpush.bf16.msra.mxu0 %v1034_v57  ;;  %v1272_v57 = vld [vmem:[#allocation6 + $0x38] sm:$0xff] }
  0x51   :  { %631 = vmatpush.bf16.msra.mxu3 %v1070_v38 }
  0x54   :  { %589 = vmatpush.bf16.msra.mxu0 %v1026_v3  ;;  %v1276_v3 = vld [vmem:[#allocation6 + $0x58] sm:$0xff] }
  0x55   :  { %997 = vmatmul.msk.bf16.vlgmr.msrb.gmra.mxu2 %vm245_vm4, %v334_v45  ;;  %v1054_v45 = vor.u32 %v1245_v40, %v1051_v41 }
  0x57   :  { %612 = vmatpush.bf16.msra.mxu2 %v1054_v45 }
  0x58   :  { %590 = vmatpush.bf16.msra.mxu0 %v1018_v9 }
  0x5b   :  { %613 = vmatpush.bf16.msra.mxu2 %v1046_v54 }
  0x5c   :  { %591 = vmatpush.bf16.msra.mxu0 %v1010_v20 }
  0x5f   :  { %614 = vmatpush.bf16.msra.mxu2 %v1038_v59  ;;  %v1280_v59 = vld [vmem:[#allocation6 + $0x78] sm:$0xff] }
  0x60   :  { %592 = vmatpush.bf16.msra.mxu0 %v1002_v29  ;;  %786 = vmatpush.bf16.msrb.mxu1 %v1280_v59  ;;  %v830_v29 = vld [vmem:[#allocation9 + $0x8] sm:$0xf] }
  0x61   :  { %v1282_v59 = vld [vmem:[#allocation7 + $0x8] sm:$0xff] }
  0x63   :  { %615 = vmatpush.bf16.msra.mxu2 %v1030_v4  ;;  %v1266_v4 = vld [vmem:[#allocation6 + $0x8] sm:$0xff] }
  0x64   :  { %773 = vmatpush.bf16.msrb.mxu0 %v1272_v57  ;;  %787 = vmatpush.bf16.msrb.mxu1 %v1279_v61  ;;  %v1284_v57 = vld [vmem:[#allocation7 + $0x18] sm:$0xff] }
  0x67   :  { %616 = vmatpush.bf16.msra.mxu2 %v1022_v11  ;;  %v1273_v11 = vld [vmem:[#allocation6 + $0x40] sm:$0xff] }
  0x6b   :  { %617 = vmatpush.bf16.msra.mxu2 %v1014_v22 }
  0x6f   :  { %618 = vmatpush.bf16.msra.mxu2 %v1006_v32  ;;  %v799_v32 = vfloor.f32 %v1634_v42  ;;  %v1286_v42 = vld [vmem:[#allocation7 + $0x28] sm:$0xff] }
  0x71   :  { %vm800_vm7 = vcmp.eq.f32.partialorder %v799_v32, 0.0  ;;  %vm815_vm8 = vcmp.eq.f32.partialorder %v799_v32, 2.0  ;;  %vm808_vm9 = vcmp.eq.f32.partialorder %v799_v32, 1.0  ;;  %vm822_vm10 = vcmp.eq.f32.partialorder %v799_v32, 3.0 }
  0x73   :  { %1191 = vmatpush.msk.msrb.mxu2 %vm838_vm6, %v830_v29 }
  0x75   :  { %857 = vmatpush.msrb.mxu2 %v829_v30 }
  0xa5   :  { %v1650_v37 = vpop.f32.mrf.mxu0  ;;  %v194_v46 = vpop.f32.mrf.mxu1 }
  0xa8   :  { %v1652_v44 = vpop.f32.mrf.mxu2 }
  0xa9   :  { %v222_v47 = vadd.f32 %v1652_v44, %v1650_v37  ;;  %v1269_v37 = vld [vmem:[#allocation6 + $0x20] sm:$0xff]  ;;  %v1278_v44 = vld [vmem:[#allocation6 + $0x68] sm:$0xff] }
  0xaa   :  { %788 = vmatpush.bf16.msrb.mxu1 %v1278_v44 }
  0xad   :  { %v183_v58 = vpop.f32.mrf.mxu0  ;;  %v196_v0 = vpop.f32.mrf.mxu1 }
  0xae   :  { %v1271_v58 = vld [vmem:[#allocation6 + $0x30] sm:$0xff]  ;;  %v1449_v0 = vmov 2   ;;  %789 = vmatpush.bf16.msrb.mxu1 %v1277_v1 }
  0xaf   :  { %v276_v2 = vpop.f32.mrf.mxu3  ;;  %774 = vmatpush.bf16.msrb.mxu0 %v1271_v58  ;;  %1304 = vset.pattern.permute.xlu1 %v1449_v0  ;;  %v1283_v58 = vld [vmem:[#allocation7 + $0x10] sm:$0xff] }
  0xb0   :  { %v223_v60 = vpop.f32.mrf.mxu2  ;;  %817 = vperm.xlu1 %1304, %v1639_v43  }
  0xb1   :  { %v1270_v60 = vld [vmem:[#allocation6 + $0x28] sm:$0xff] }
  0xb2   :  { %790 = vmatpush.bf16.msrb.mxu1 %v1276_v3 }
  0xb3   :  { %775 = vmatpush.bf16.msrb.mxu0 %v1270_v60  ;;  %v1281_v60 = vld [vmem:[#allocation7] sm:$0xff] }
  0xb5   :  { %v314_v10 = vpop.f32.mrf.mxu0  ;;  %v327_v14 = vpop.f32.mrf.mxu1 }
  0xb6   :  { %791 = vmatpush.bf16.msrb.mxu1 %v1275_v5 }
  0xb7   :  { %v278_v15 = vpop.f32.mrf.mxu3  ;;  %776 = vmatpush.bf16.msrb.mxu0 %v1269_v37 }
  0xb8   :  { %v234_v12 = vpop.f32.mrf.mxu2  ;;  %v419_v15 = vld [vmem:[%s1689_s12] sm:$0x3] }
  0xb9   :  { %v235_v13 = vadd.f32 %v234_v12, %v194_v46  ;;  %v421_v16 = vperm.slane %v419_v15, 0  ;;  %v422_v20 = vperm.slane %v419_v15, 1 }
  0xba   :  { %792 = vmatpush.bf16.msrb.mxu1 %v1274_v8 }
  0xbb   :  { %v281_v19 = vadd.f32 %v276_v2, %v235_v13  ;;  %777 = vmatpush.bf16.msrb.mxu0 %v1268_v62  ;;  %v1267_v2 = vld [vmem:[#allocation6 + $0x10] sm:$0xff]  ;;  %v1308_v62 = vld [vmem:[%s1694_s17] ss:$0 sm:$0xff] }
  0xbd   :  { %v332_v27 = vadd.f32 %v327_v14, %v281_v19  ;;  %v316_v28 = vpop.f32.mrf.mxu0  ;;  %v329_v34 = vpop.f32.mrf.mxu1 }
  0xbe   :  { %793 = vmatpush.bf16.msrb.mxu1 %v1273_v11 }
  0xbf   :  { %v369_v35 = vpop.f32.mrf.mxu3  ;;  %778 = vmatpush.bf16.msrb.mxu0 %v1267_v2 }
  0xc0   :  { %v236_v31 = vpop.f32.mrf.mxu2  ;;  %v374_v36 = vadd.f32 %v369_v35, %v332_v27 }
  0xc1   :  { %v804_v31 = vpop.permute.xlu0 %803 }
  0xc2   :  { %v382_v38 = vadd.f32 %v378_v33, %v374_v36  ;;  %v806_v34 = vsel %vm800_vm7, %v804_v31, 0.0 }
  0xc3   :  { %779 = vmatpush.bf16.msrb.mxu0 %v1266_v4 }
  0xc4   :  { %v384_v39 = vmax.f32 %v382_v38, 0.0 }
  0xc6   :  { %v386_v41 = vpack.c.bf16 %v384_v39, %v384_v39 }
  0xc7   :  { %v371_v45 = vpop.f32.mrf.mxu3  ;;  %780 = vmatpush.bf16.msrb.mxu0 %v1265_v7 }
  0xc8   :  { %v263_v40 = vpop.f32.mrf.mxu2  ;;  %606 = vmatmul.bf16.vlgmr.msra.gmra.mxu1 %v386_v41  ;;  %632 = vmatmul.bf16.vlgmr.msra.gmra.mxu3 %v386_v41 }
  0xc9   :  { %v280_v48 = vadd.f32 %v263_v40, %v222_v47  ;;  %v811_v35 = vpop.permute.xlu0 %810  ;;  %v1288_v47 = vld [vmem:[#allocation7 + $0x38] sm:$0xff] }
  0xca   :  { %v813_v38 = vsel %vm808_vm9, %v811_v35, 0.0  ;;  %933 = vmatpush.bf16.msrb.mxu3 %v1288_v47 }
  0xcb   :  { %v331_v49 = vadd.f32 %v314_v10, %v280_v48  ;;  %v1451_v10 = vmov 3   ;;  %v814_v39 = vadd.f32 %v813_v38, %v806_v34  ;;  %v1287_v48 = vld [vmem:[#allocation7 + $0x30] sm:$0xff] }
  0xcc   :  { %1305 = vset.pattern.permute.xlu1 %v1451_v10  ;;  %1306 = vset.pattern.permute.xlu0 %v1451_v10 }
  0xcd   :  { %824 = vperm.xlu1 %1305, %v1639_v43  }
  0xce   :  { %934 = vmatpush.bf16.msrb.mxu3 %v1287_v48 }
  0xd0   :  { %v265_v46 = vpop.f32.mrf.mxu2 }
  0xd2   :  { %935 = vmatpush.bf16.msrb.mxu3 %v1286_v42 }
  0xd8   :  { %v356_v51 = vpop.f32.mrf.mxu2 }
  0xd9   :  { %v373_v52 = vadd.f32 %v356_v51, %v331_v49  ;;  %v1285_v49 = vld [vmem:[#allocation7 + $0x20] sm:$0xff]  ;;  %v1307_v51 = vld [vmem:[%s1691_s14] ss:$0 sm:$0xff] }
  0xda   :  { %936 = vmatpush.bf16.msrb.mxu3 %v1285_v49 }
  0xdb   :  { %v381_v53 = vadd.f32 %v377_v50, %v373_v52 }
  0xdd   :  { %v383_v54 = vmax.f32 %v381_v53, 0.0 }
  0xde   :  { %937 = vmatpush.bf16.msrb.mxu3 %v1284_v57 }
  0xdf   :  { %v385_v55 = vpack.c.bf16 %v383_v54, %v383_v54 }
  0xe0   :  { %v358_v56 = vpop.f32.mrf.mxu2 }
  0xe1   :  { %593 = vmatmul.bf16.vlgmr.msra.gmra.mxu0 %v385_v55  ;;  %619 = vmatmul.bf16.vlgmr.msra.gmra.mxu2 %v385_v55 }
  0xe2   :  { %938 = vmatpush.bf16.msrb.mxu3 %v1283_v58 }
  0xe6   :  { %939 = vmatpush.bf16.msrb.mxu3 %v1282_v59 }
  0xea   :  { %940 = vmatpush.bf16.msrb.mxu3 %v1281_v60 }
 0x122   :  { %v818_v33 = vpop.permute.xlu1 %817 }
 0x123   :  { %v820_v36 = vsel %vm815_vm8, %v818_v33, 0.0 }
 0x124   :  { %v821_v41 = vadd.f32 %v820_v36, %v814_v39 }
 0x13f   :  { %v825_v40 = vpop.permute.xlu1 %824 }
 0x140   :  { %v827_v45 = vsel %vm822_vm10, %v825_v40, 0.0 }
 0x141   :  { %v828_v46 = vadd.f32 %v827_v45, %v821_v41 }
 0x143   :  { %1192 = vmatmul.msk.f32.vlgmr.msrb.gmra.mxu2 %vm294_vm5, %v828_v46 }
 0x145   :  { %v607_v9 = vpop.f32.mrf.mxu1 }
 0x14b   :  { %v633_v12 = vpop.f32.mrf.mxu3 }
 0x14d   :  { %v609_v13 = vpop.f32.mrf.mxu1 }
 0x153   :  { %v635_v14 = vpop.f32.mrf.mxu3 }
 0x15e   :  { %v594_v17 = vpop.f32.mrf.mxu0 }
 0x15f   :  { %v595_v18 = vadd.f32 %v594_v17, %v421_v16 }
 0x161   :  { %v608_v19 = vadd.f32 %v607_v9, %v595_v18 }
 0x163   :  { %v637_v21 = vmax.f32 %v608_v19, 0.0 }
 0x164   :  { %v620_v22 = vpop.f32.mrf.mxu2 }
 0x165   :  { %v639_v23 = vpack.c.bf16 %v637_v21, %v637_v21  ;;  %v621_v24 = vadd.f32 %v620_v22, %v422_v20 }
 0x166   :  { %v596_v43 = vpop.f32.mrf.mxu0 }
 0x167   :  { %v634_v25 = vadd.f32 %v633_v12, %v621_v24  ;;  %781 = vmatmul.bf16.vlgmr.msrb.gmra.mxu0 %v639_v23 }
 0x169   :  { %v638_v26 = vmax.f32 %v634_v25, 0.0 }
 0x16b   :  { %v640_v27 = vpack.c.bf16 %v638_v26, %v638_v26 }
 0x16c   :  { %v622_v28 = vpop.f32.mrf.mxu2 }
 0x16d   :  { %794 = vmatmul.bf16.vlgmr.msrb.gmra.mxu1 %v640_v27 }
 0x1c6   :  { %v859_v63 = vpop.f32.mrf.mxu2 }
 0x1c7   :  { %v860_v0 = vadd.f32 %v1308_v62, %v859_v63 }
 0x1e4   :  { %v782_v50 = vpop.f32.mrf.mxu0 }
 0x1e5   :  { %v783_v52 = vadd.f32 %v1307_v51, %v782_v50 }
 0x1ea   :  { %v795_v53 = vpop.f32.mrf.mxu1 }
 0x1eb   :  { %v796_v54 = vadd.f32 %v795_v53, %v783_v52 }
 0x1ec   :  { %v784_v55 = vpop.f32.mrf.mxu0 }
 0x1ed   :  { %862 = vmax.xlane.f32.xlu2 %v796_v54 }
 0x1f2   :  { %v797_v56 = vpop.f32.mrf.mxu1 }
 0x260   :  { %v863_v61 = vpop.xlane.xlu2 %862 }
 0x261   :  { %v864_v37 = vsub.f32 %v796_v54, %v863_v61 }
 0x263   :  { %v865_v44 = vmul.f32 1.442695, %v864_v37 }
 0x265   :  { %1309 = vpow2.f32 %v865_v44 }
 0x26b   :  { %v1310_v1 = vpop.eup %1309 }
 0x26c   :  { %v867_v2 = vmul.f32 %v1310_v1, %v860_v0 }
 0x26e   :  { %v868_v3 = vpack.c.bf16 %v867_v2, %v867_v2 }
 0x270   :  { %941 = vmatmul.bf16.vlgmr.msrb.gmra.mxu3 %v868_v3 }
 0x2f3   :  { %v942_v4 = vpop.f32.mrf.mxu3 }
 0x2f4   :  { %v946_v5 = vmax.f32 %v942_v4, 1e-30 }
 0x2f6   :  { %1311 = vrcp.f32 %v946_v5 }
 0x2fb   :  { %v944_v6 = vpop.f32.mrf.mxu3 }
 0x2fc   :  { %v1312_v7 = vpop.eup %1311 }
 0x2fd   :  { %v948_v8 = vmul.f32 %v1312_v7, %v867_v2 }
 0x2ff   :  { %949 = vst [vmem:[%s1695_s18] sm:$0xff] %v948_v8 }
 0x300   :  { %954 = vsyncpa [#allocation3], 1 }
 0x301   :  { %955 = vsyncpa [#allocation5], 1 }
 0x302   :  { %956 = vsyncpa [#allocation8], 1 }

</bundles_post_ra>
